<compile_context>
chip_gen: v5e
topology: v5e:2x2
jax: 0.10.0
libtpu: 0.0.40
codegen_flags: <defaults>
</compile_context>

<pallas_src>
import jax
import jax.numpy as jnp
from jax.experimental import pallas as pl
from jax.experimental.pallas import tpu as pltpu


def _skip_linear_kernel(x1_ref, x2_ref, w_ref, b_ref, o_ref):
    """One grid step == one batch element.

    x1_ref: (1, d1*m, m)       rows of in1[n] (channel-major, spatial-row-major)
    x2_ref: (1, d2*m, m)       rows of in2[n]
    w_ref : (m, F)             resident weight (W.T); contracts the width axis
    b_ref : (1, F)             resident bias
    o_ref : (1, (d1+d2)*m, F)  rows of out[n] — concat fused (in1 rows first)
    """
    r1 = x1_ref.shape[1]
    r2 = x2_ref.shape[1]

    w = w_ref[...]                      # (m, F)
    b = b_ref[...]                      # (1, F) — broadcasts over rows

    # One MXU matmul per channel group; contraction axis is the spatial width m.
    y1 = jnp.dot(x1_ref[0], w, preferred_element_type=jnp.float32) + b   # (d1*m, F)
    y2 = jnp.dot(x2_ref[0], w, preferred_element_type=jnp.float32) + b   # (d2*m, F)

    # Write both channel slabs of the interleaved output -> concat fully fused.
    o_ref[0, 0:r1, :] = y1.astype(o_ref.dtype)
    o_ref[0, r1:r1 + r2, :] = y2.astype(o_ref.dtype)


def skip_connection_forward(in1, in2, weight, bias):
    """in1: (N, d1, m, m), in2: (N, d2, m, m); weight: (out_features, in_features=m)."""
    N, d1, m, m2 = in1.shape
    N2, d2, m3, m4 = in2.shape
    assert N == N2, "batch dims must match"
    assert m == m2 == m3 == m4, "spatial dims must match"
    F = weight.shape[0]
    assert weight.shape[1] == m, "nn.Linear in_features must equal spatial size m"
    C = d1 + d2

    # Free (contiguous-merge) reshapes: no HBM copies.
    x1 = in1.reshape(N, d1 * m, m)
    x2 = in2.reshape(N, d2 * m, m)
    w_t = weight.T.astype(in1.dtype)            # (m, F), tiny, read once, VMEM-resident
    b = bias.reshape(1, F).astype(jnp.float32)

    out = pl.pallas_call(
        _skip_linear_kernel,
        out_shape=jax.ShapeDtypeStruct((N, C * m, F), in1.dtype),
        grid_spec=pltpu.PrefetchScalarGridSpec(
            num_scalar_prefetch=0,
            grid=(N,),                                               # one step per batch
            in_specs=[
                pl.BlockSpec((1, d1 * m, m), lambda n: (n, 0, 0)),   # in1[n] slab
                pl.BlockSpec((1, d2 * m, m), lambda n: (n, 0, 0)),   # in2[n] slab
                pl.BlockSpec((m, F), lambda n: (0, 0)),              # weight resident
                pl.BlockSpec((1, F), lambda n: (0, 0)),              # bias resident
            ],
            out_specs=pl.BlockSpec((1, C * m, F), lambda n: (n, 0, 0)),
        ),
        compiler_params=pltpu.CompilerParams(
            dimension_semantics=("parallel",)),                      # shard over 2 TCs
    )(x1, x2, w_t, b)

    # Free (contiguous-split) reshape back to (N, C, m, F).
    return out.reshape(N, C, m, F)


def init_skip_connection_params(key, in_features, out_features):
    """Deterministic xavier_uniform_ weight, zero bias (matches _init_weights)."""
    bound = (6.0 / (in_features + out_features)) ** 0.5
    weight = jax.random.uniform(
        key, (out_features, in_features), dtype=jnp.float32,
        minval=-bound, maxval=bound)
    bias = jnp.zeros((out_features,), dtype=jnp.float32)
    return weight, bias


if __name__ == "__main__":
    # Small shapes consistent with the forward: N x d1 x m x m and N x d2 x m x m.
    N, d1, d2, m = 2, 2, 2, 16
    in_features = m          # nn.Linear contracts the last (width) axis
    out_features = 32

    key = jax.random.PRNGKey(0)
    k_w, k1, k2 = jax.random.split(key, 3)
    weight, bias = init_skip_connection_params(k_w, in_features, out_features)

    in1 = jax.random.normal(k1, (N, d1, m, m), dtype=jnp.float32)
    in2 = jax.random.normal(k2, (N, d2, m, m), dtype=jnp.float32)

    fwd = jax.jit(skip_connection_forward)
    out = fwd(in1, in2, weight, bias)
    out = jax.block_until_ready(out)

    # Reference check in plain JAX (same semantics as torch.cat + nn.Linear).
    ref = jnp.einsum("nchw,ow->ncho",
                     jnp.concatenate((in1, in2), axis=1), weight) + bias
    assert out.shape == (N, d1 + d2, m, out_features)
    assert jnp.allclose(out, ref, atol=1e-5, rtol=1e-5)

    print("KERNEL_OK")
</pallas_src>

<mosaic_0001>
module attributes {stable_mosaic.version = 11 : i64} {
  func.func @_skip_linear_kernel(%arg0: i32, %arg1: memref<1x32x16xf32, #tpu.memory_space<vmem>>, %arg2: memref<1x32x16xf32, #tpu.memory_space<vmem>>, %arg3: memref<16x32xf32, #tpu.memory_space<vmem>>, %arg4: memref<1x32xf32, #tpu.memory_space<vmem>>, %arg5: memref<1x64x32xf32, #tpu.memory_space<vmem>>) attributes {dimension_semantics = [#tpu.dimension_semantics<parallel>], iteration_bounds = array<i64: 2>, scalar_prefetch = 0 : i64, scratch_operands = 0 : i64, tpu.core_type = #tpu.core_type<tc>, window_params = [{transform_indices = @transform_0, window_bounds = array<i64: 1, 32, 16>}, {transform_indices = @transform_1, window_bounds = array<i64: 1, 32, 16>}, {pipeline_mode = #tpu.pipeline_mode<synchronous>, transform_indices = @transform_2, window_bounds = array<i64: 16, 32>}, {pipeline_mode = #tpu.pipeline_mode<synchronous>, transform_indices = @transform_3, window_bounds = array<i64: 1, 32>}, {transform_indices = @transform_4, window_bounds = array<i64: 1, 64, 32>}]} {
    %c0 = arith.constant 0 : index
    %c0_0 = arith.constant 0 : index
    %0 = vector.load %arg3[%c0, %c0_0] : memref<16x32xf32, #tpu.memory_space<vmem>>, vector<16x32xf32>
    %c0_1 = arith.constant 0 : index
    %c0_2 = arith.constant 0 : index
    %1 = vector.load %arg4[%c0_1, %c0_2] : memref<1x32xf32, #tpu.memory_space<vmem>>, vector<1x32xf32>
    %c0_3 = arith.constant 0 : index
    %c0_4 = arith.constant 0 : index
    %c0_5 = arith.constant 0 : index
    %2 = vector.load %arg1[%c0_3, %c0_4, %c0_5] : memref<1x32x16xf32, #tpu.memory_space<vmem>>, vector<1x32x16xf32>
    %3 = vector.shape_cast %2 : vector<1x32x16xf32> to vector<32x16xf32>
    %cst = arith.constant dense<0.000000e+00> : vector<32x32xf32>
    %4 = tpu.matmul %3, %0, %cst {dimension_numbers = #tpu.dot_dimension_numbers<[1], [0], [0], [1], [0, 0, 1, 1], [], []>} : vector<32x16xf32>, vector<16x32xf32>, vector<32x32xf32> -> vector<32x32xf32>
    %5 = vector.broadcast %1 : vector<1x32xf32> to vector<32x32xf32>
    %6 = arith.addf %4, %5 : vector<32x32xf32>
    %c0_6 = arith.constant 0 : index
    %c0_7 = arith.constant 0 : index
    %c0_8 = arith.constant 0 : index
    %7 = vector.load %arg2[%c0_6, %c0_7, %c0_8] : memref<1x32x16xf32, #tpu.memory_space<vmem>>, vector<1x32x16xf32>
    %8 = vector.shape_cast %7 : vector<1x32x16xf32> to vector<32x16xf32>
    %cst_9 = arith.constant dense<0.000000e+00> : vector<32x32xf32>
    %9 = tpu.matmul %8, %0, %cst_9 {dimension_numbers = #tpu.dot_dimension_numbers<[1], [0], [0], [1], [0, 0, 1, 1], [], []>} : vector<32x16xf32>, vector<16x32xf32>, vector<32x32xf32> -> vector<32x32xf32>
    %10 = vector.broadcast %1 : vector<1x32xf32> to vector<32x32xf32>
    %11 = arith.addf %9, %10 : vector<32x32xf32>
    %c0_10 = arith.constant 0 : index
    %c0_11 = arith.constant 0 : index
    %c0_12 = arith.constant 0 : index
    %12 = vector.load %arg5[%c0_10, %c0_11, %c0_12] : memref<1x64x32xf32, #tpu.memory_space<vmem>>, vector<1x32x32xf32>
    %13 = vector.shape_cast %12 : vector<1x32x32xf32> to vector<32x32xf32>
    %14 = vector.shape_cast %6 : vector<32x32xf32> to vector<1x32x32xf32>
    tpu.vector_store %arg5[%c0_10, %c0_11, %c0_12], %14 {strides = array<i32>} : memref<1x64x32xf32, #tpu.memory_space<vmem>>, vector<1x32x32xf32>,
    %c0_13 = arith.constant 0 : index
    %c32 = arith.constant 32 : index
    %c0_14 = arith.constant 0 : index
    %15 = vector.load %arg5[%c0_13, %c32, %c0_14] : memref<1x64x32xf32, #tpu.memory_space<vmem>>, vector<1x32x32xf32>
    %16 = vector.shape_cast %15 : vector<1x32x32xf32> to vector<32x32xf32>
    %17 = vector.shape_cast %11 : vector<32x32xf32> to vector<1x32x32xf32>
    tpu.vector_store %arg5[%c0_13, %c32, %c0_14], %17 {strides = array<i32>} : memref<1x64x32xf32, #tpu.memory_space<vmem>>, vector<1x32x32xf32>,
    return
  }
  func.func @transform_0(%arg0: i32) -> (i32, i32, i32) {
    %c0_i32 = arith.constant 0 : i32
    %c0_i32_0 = arith.constant 0 : i32
    %c0_i32_1 = arith.constant 0 : i32
    return %arg0, %c0_i32, %c0_i32_0 : i32, i32, i32
  }
  func.func @transform_1(%arg0: i32) -> (i32, i32, i32) {
    %c0_i32 = arith.constant 0 : i32
    %c0_i32_0 = arith.constant 0 : i32
    %c0_i32_1 = arith.constant 0 : i32
    return %arg0, %c0_i32, %c0_i32_0 : i32, i32, i32
  }
  func.func @transform_2(%arg0: i32) -> (i32, i32) {
    %c0_i32 = arith.constant 0 : i32
    %c0_i32_0 = arith.constant 0 : i32
    %c0_i32_1 = arith.constant 0 : i32
    return %c0_i32, %c0_i32_0 : i32, i32
  }
  func.func @transform_3(%arg0: i32) -> (i32, i32) {
    %c0_i32 = arith.constant 0 : i32
    %c0_i32_0 = arith.constant 0 : i32
    %c0_i32_1 = arith.constant 0 : i32
    return %c0_i32, %c0_i32_0 : i32, i32
  }
  func.func @transform_4(%arg0: i32) -> (i32, i32, i32) {
    %c0_i32 = arith.constant 0 : i32
    %c0_i32_0 = arith.constant 0 : i32
    %c0_i32_1 = arith.constant 0 : i32
    return %arg0, %c0_i32, %c0_i32_0 : i32, i32, i32
  }
}

</mosaic_0001>

<bundles_post_ra>
// kernel: skip_connection_forward.1
= control target key start
LH: loop header
LB: loop body
LE: loop exit
PB: predicated region body
PF: predicated region fallthrough
CT: control target
= control target key end

     0   :  { %s1002_s0 = inlined_call_operand.hbm [shape: f32[2,32,16], index: 0, kind: input, shape index: {}]   ;;  %s1003_s1 = inlined_call_operand.hbm [shape: f32[2,32,16], index: 1, kind: input, shape index: {}]   ;;  %s1004_s2 = inlined_call_operand.hbm [shape: f32[16,32], index: 2, kind: input, shape index: {}]   ;;  %s1005_s3 = inlined_call_operand.vmem [shape: f32[1,32], index: 3, kind: input, shape index: {}]   ;;  %s1006_s4 = inlined_call_operand.hbm [shape: f32[2,64,32], index: 4, kind: output, shape index: {}]  }
   0x1   :  { %1011 = sst [smem:[#allocation13_spill]] %s1002_s0 }
   0x2   :  { %1012 = sst [smem:[#allocation14_spill]] %s1004_s2 }
   0x3   :  { %9 = vsyncpa [#allocation3], 0 }
   0x4   :  { %11 = vsyncpa [#allocation3 + $0x1], 0 }
   0x5   :  { %12 = vsyncpa [#allocation6], 0 }
   0x6   :  { %14 = vsyncpa [#allocation6 + $0x1], 0 }
   0x7   :  { %15 = vsyncpa [#allocation4], 0 }
   0x8   :  { %17 = vsyncpa [#allocation4 + $0x1], 0  ;;  %s801_s15 = smov 0   ;;  %s803_s16 = smov 0  }
   0x9   :  { %s805_s17 = smov 0   ;;  %s807_s18 = smov 0  }
   0xa LB: > { %s822_s19 = sadd.s32 4294967295, %s769_s18   ;;  %s503_s20 = sadd.s32 4294967294, %s769_s18   ;;  %s769_s18 = sphi %s807_s18, %s1026_s18   ;;  %s765_s17 = sphi %s805_s17, %s1025_s17   ;;  %s761_s16 = sphi %s803_s16, %s1024_s16   ;;  %s757_s15 = sphi %s801_s15, %s1023_s15  }
   0xb   : > { %p43_p0 = scmp.ne.s32.totalorder %s761_s16, %s757_s15  ;;  %p44_p1 = scmp.eq.s32.totalorder %s822_s19, 0 }
   0xc   : > { %p135_p2 = scmp.eq.s32.totalorder %s822_s19, 1  ;;  %p141_p3 = scmp.eq.s32.totalorder %s503_s20, 1 }
   0xd   : > { %p831_p4 = por %p44_p1, %p43_p0  ;;  %p504_p5 = scmp.ge.s32.totalorder %s769_s18, 1 }
   0xe   : > { %p836_p6 = por %p141_p3, %p43_p0  ;;  %p148_p7 = scmp.lt.s32.totalorder %s769_s18, 3 }
   0xf   : > { %s1015_s2 = sld [smem:[#allocation14_spill]]  ;;  %s771_s27 = smov [#allocation7]  }
  0x10   : > { %p844_p8 = pnand %p504_p5, %p148_p7  ;;  %s161_s28 = sshll.u32 %s771_s27, 4  ;;  %s162_s28 = int_to_ptr.vmem [resolvable:$true] %s161_s28 }
  0x11   : > { %s854_s29 = sadd.s32 1, %s769_s18   ;;  %s1007_s30 = smov 128  }
  0x12   : > { %p548_p9 = pneg %p844_p8  ;;  %s1009_s5 = smov 8  }
  0x13   : > { %s27_s6 = ssub.s32 %s769_s18, %s854_s29  ;;  %s30_s7 = sadd.s32 1, %s765_s17 }
  0x14   : > { %p549_p10 = pnand %p548_p9, %p44_p1  ;;  %p28_p12 = scmp.eq.s32.totalorder %s27_s6, 0 }
  0x15   : > { %s159_s25 = sshll.u32 %s1015_s2, 4  ;;  %p37_p13 = scmp.ne.s32.totalorder %s765_s17, %s761_s16  ;;  %s160_s25 = int_to_ptr.hbm [resolvable:$true] %s159_s25 }
  0x16   : > { %551 = dma.hbm_to_vmem [thread:$0]  (!%p549_p10), %s160_s25, 256, %s162_s28, [#allocation6], %s1007_s30, %s1007_s30, %s1009_s5  }
  0x17   : > { %p38_p0 = scmp.eq.s32.totalorder %s769_s18, 0  ;;  %p564_p3 = scmp.lt.s32.totalorder %s769_s18, 2 }
  0x18   : > { %s867_s8 = scalar_select %p28_p12, %s765_s17, %s30_s7  }
  0x19   : > { %p39_p5 = por %p38_p0, %p37_p13  ;;  %p871_p7 = por %p135_p2, %p37_p13 }
  0x1a   : > { %s178_s10 = sand.u32 1, %s765_s17   ;;  %s531_s11 = sshll.u32 %s769_s18, 5 }
  0x1b   : > { %s507_s12 = sshll.u32 %s178_s10, 5  ;;  %s1018_s0 = sld [smem:[#allocation13_spill]] }
  0x1c   : > { %s182_s24 = scalar_lea.vmem [#allocation2], %s507_s12  ;;  %p882_p9 = pnand %p564_p3, %p39_p5 }
  0x1d   : > { %s190_s25 = sshll.u32 %s182_s24, 4  ;;  %s209_s7 = scalar_lea.hbm %s1003_s1, %s531_s11  ;;  %s191_s25 = int_to_ptr.vmem [resolvable:$true] %s190_s25 }
  0x1e   : > { %s204_s30 = scalar_lea.vmem [#allocation5], %s507_s12  ;;  %s210_s13 = sshll.u32 %s209_s7, 4  ;;  %s211_s13 = int_to_ptr.hbm [resolvable:$true] %s210_s13 }
  0x1f   : > { %s889_s5 = sshll.u32 %s204_s30, 4  ;;  %s179_s14 = scalar_lea.sflag [#allocation3], %s178_s10  ;;  %s213_s5 = int_to_ptr.vmem [resolvable:$true] %s889_s5 }
  0x20   : > { %p639_p10 = pneg %p882_p9 }
  0x21   : > { %s187_s20 = scalar_lea.hbm %s1018_s0, %s531_s11  ;;  %s642_s6 = scalar_lea.hbm %s1018_s0, 64 }
  0x22   : > { %s188_s23 = sshll.u32 %s187_s20, 4  ;;  %s189_s23 = int_to_ptr.hbm [resolvable:$true] %s188_s23 }
  0x23   : > { %s635_s20 = sshra.s32 %s189_s23, 4  ;;  %s636_s20 = int_to_ptr.hbm [resolvable:$true] %s635_s20 }
  0x24   : > { %s637_s24 = scalar_lea.hbm %s636_s20, 32  ;;  %p643_p0 = scmp.lt.s32.totalorder %s636_s20, %s1018_s0 }
  0x25   : > { %p638_p2 = scmp.ne.s32.totalorder %s636_s20, %s637_s24  ;;  %p644_p3 = scmp.lt.s32.totalorder %s642_s6, %s637_s24 }
  0x27   : > { %p640_p12 = pnand %p639_p10, %p638_p2  ;;  %p645_p5 = por %p644_p3, %p643_p0 }
  0x29   : > { %p641_p13 = pneg %p640_p12 }
  0x2b   : > { %p646_p11 = pnand %p645_p5, %p641_p13 }
  0x2d   : > { %649 = shalt.err (!%p646_p11)
}
  0x2e   : > { %s1020_s30 = smov 8   ;;  %s1021_s10 = smov 128  }
  0x2f   : > { %555 = dma.hbm_to_vmem [thread:$0]  (!%p882_p9), %s189_s23, 512, %s191_s25, %s179_s14, %s1021_s10, %s1021_s10, %s1020_s30  }
  0x30   : > { %s200_s2 = sand.u32 1, %s769_s18   ;;  %s665_s28 = sshra.s32 %s211_s13, 4  ;;  %s666_s28 = int_to_ptr.hbm [resolvable:$true] %s665_s28 }
  0x31   : > { %s201_s7 = scalar_lea.sflag [#allocation6], %s200_s2  ;;  %s667_s20 = scalar_lea.hbm %s666_s28, 32 }
  0x32   : > { %p668_p2 = scmp.ne.s32.totalorder %s666_s28, %s667_s20  ;;  %s672_s11 = scalar_lea.hbm %s1003_s1, 64 }
  0x33   : > { %p673_p13 = scmp.lt.s32.totalorder %s666_s28, %s1003_s1  ;;  %p674_p0 = scmp.lt.s32.totalorder %s672_s11, %s667_s20 }
  0x34   : > { %p670_p11 = pnand %p668_p2, %p639_p10 }
  0x35   : > { %p675_p3 = por %p674_p0, %p673_p13 }
  0x36   : > { %p671_p12 = pneg %p670_p11 }
  0x38   : > { %p676_p5 = pnand %p675_p3, %p671_p12 }
  0x3a   : > { %679 = shalt.err (!%p676_p5)
}
  0x3b   : > { %558 = dma.hbm_to_vmem [thread:$0]  (!%p882_p9), %s211_s13, 512, %s213_s5, %s201_s7, %s1021_s10, %s1021_s10, %s1020_s30  }
  0x3c   : > { %224 = sbr.rel (%p844_p8) target bundleno = 222 (0xde), region = 36  ;;  %s926_s23 = sand.u32 (!%p844_p8), 1, %s761_s16  }
  0x3d   : > { %s514_s0 = sshll.u32 (!%p844_p8), %s926_s23, 5  ;;  %s227_s25 = scalar_lea.sflag (!%p844_p8), [#allocation3], %s926_s23 }
  0x3e   : > { %s930_s14 = scalar_lea.vmem (!%p844_p8), [#allocation2], %s514_s0 }
  0x41   : > { %740 = dma.done.wait (%p831_p4), %s227_s25, 512  }
  0x42   : > { %742 = vsyncadd (%p831_p4), %s227_s25, 4294966784  ;;  %s236_s5 = sand.u32 1, %s822_s19   ;;  %s240_s27 = scalar_lea.vmem [#allocation5], %s514_s0 }
  0x43   : > { %s237_s26 = scalar_lea.sflag [#allocation6], %s236_s5 }
  0x44   : > { %744 = dma.done.wait (%p831_p4), %s237_s26, 512  }
  0x45   : > { %746 = vsyncadd (%p831_p4), %s237_s26, 4294966784 }
  0x46   : > { %748 = dma.done.wait (%p44_p1), [#allocation6], 256  }
  0x47   : > { %750 = vsyncadd (%p44_p1), [#allocation6], 4294967040  ;;  %v277_v0 = vld [vmem:[#allocation7 + $0x8] sm:$0xff]  ;;  %v276_v1 = vld [vmem:[#allocation7] sm:$0xff]  ;;  %vm286_vm0 = vcmask 130048   ;;  %s517_s21 = sshll.u32 %s926_s23, 6 }
  0x48   : > { %534 = vmatpush.msra.mxu2 %v277_v0  ;;  %536 = vmatpush.msra.mxu3 %v277_v0  ;;  %v281_v2 = vld [vmem:[%s930_s14 + $0x10] sm:$0xff]  ;;  %v279_v4 = vld [vmem:[%s930_s14] sm:$0xff]  ;;  %v282_v6 = vld [vmem:[%s930_s14 + $0x18] sm:$0xff]  ;;  %vm373_vm1 = vcmask 261120   ;;  %s275_s10 = scalar_lea.vmem [#allocation8], %s517_s21  ;;  %s533_s2 = sshll.u32 %s822_s19, 6 }
  0x49   : > { %v330_v3 = vld [vmem:[%s240_s27 + $0x10] sm:$0xff]  ;;  %313 = vmatpush.msra.mxu0 %v277_v0  ;;  %358 = vmatpush.msra.mxu1 %v277_v0  ;;  %v328_v5 = vld [vmem:[%s240_s27] sm:$0xff]  ;;  %v331_v7 = vld [vmem:[%s240_s27 + $0x18] sm:$0xff]  ;;  %s394_s20 = scalar_lea.hbm %s1006_s4, %s533_s2  ;;  %s395_s24 = sshll.u32 %s275_s10, 4  ;;  %s396_s24 = int_to_ptr.vmem [resolvable:$true] %s395_s24 }
  0x4a   : > { %535 = vmatpush.msra.mxu2 %v276_v1  ;;  %537 = vmatpush.msra.mxu3 %v276_v1  ;;  %v280_v8 = vld [vmem:[%s930_s14 + $0x8] sm:$0xff]  ;;  %v604_v10 = vld [vmem:[%s1005_s3] ss:$0 sm:$0xff]  ;;  %s397_s6 = sshll.u32 %s394_s20, 4  ;;  %s383_s19 = scalar_lea.sflag [#allocation4], %s926_s23  ;;  %s398_s6 = int_to_ptr.hbm [resolvable:$true] %s397_s6 }
  0x4b   : > { %520 = vmatmul.msk.f32.vlgmr.msra.gmra.mxu2 %vm286_vm0, %v281_v2  ;;  %524 = vmatmul.msk.f32.vlgmr.msra.gmra.mxu3 %vm286_vm0, %v330_v3  ;;  %v329_v9 = vld [vmem:[%s240_s27 + $0x8] sm:$0xff]  ;;  %s709_s11 = sshra.s32 %s398_s6, 4  ;;  %s715_s14 = scalar_lea.hbm %s1006_s4, 128  ;;  %s710_s11 = int_to_ptr.hbm [resolvable:$true] %s709_s11 }
  0x4c   : > { %314 = vmatpush.msra.mxu0 %v276_v1  ;;  %359 = vmatpush.msra.mxu1 %v276_v1  ;;  %s711_s12 = scalar_lea.hbm %s710_s11, 64  ;;  %p716_p9 = scmp.lt.s32.totalorder %s710_s11, %s1006_s4 }
  0x4d   : > { %518 = vmatmul.msk.f32.vlgmr.msra.gmra.mxu0 %vm286_vm0, %v279_v4  ;;  %522 = vmatmul.msk.f32.vlgmr.msra.gmra.mxu1 %vm286_vm0, %v328_v5  ;;  %p712_p1 = scmp.ne.s32.totalorder %s710_s11, %s711_s12  ;;  %p717_p10 = scmp.lt.s32.totalorder %s715_s14, %s711_s12 }
  0x4f   : > { %p713_p4 = pnand %p712_p1, %p871_p7  ;;  %p718_p2 = por %p717_p10, %p716_p9 }
  0x51   : > { %p714_p8 = pneg %p713_p4 }
  0x53   : > { %521 = vmatmul.msk.f32.gmra.mxu2 %vm286_vm0, %v282_v6  ;;  %525 = vmatmul.msk.f32.gmra.mxu3 %vm286_vm0, %v331_v7  ;;  %p719_p11 = pnand %p718_p2, %p714_p8 }
  0x55   : > { %519 = vmatmul.msk.f32.gmra.mxu0 %vm286_vm0, %v280_v8  ;;  %523 = vmatmul.msk.f32.gmra.mxu1 %vm286_vm0, %v329_v9 }
  0xca   : > { %v316_v11 = vpop.f32.mrf.mxu0  ;;  %v361_v12 = vpop.f32.mrf.mxu1 }
  0xcb   : > { %v317_v13 = vadd.f32 %v604_v10, %v316_v11  ;;  %v362_v14 = vadd.f32 %v604_v10, %v361_v12 }
  0xcd   : > { %374 = vst.msk [vmem:[%s275_s10] sm:$0xff] %vm373_vm1, %v317_v13 }
  0xce   : > { %v322_v15 = vpop.f32.mrf.mxu2  ;;  %378 = vst.msk [vmem:[%s275_s10 + $0x20] sm:$0xff] %vm373_vm1, %v362_v14  ;;  %v367_v16 = vpop.f32.mrf.mxu3 }
  0xcf   : > { %v323_v17 = vadd.f32 %v604_v10, %v322_v15  ;;  %v368_v18 = vadd.f32 %v604_v10, %v367_v16 }
  0xd1   : > { %376 = vst.msk [vmem:[%s275_s10 + $0x10] sm:$0xff] %vm373_vm1, %v323_v17 }
  0xd2   : > { %380 = vst.msk [vmem:[%s275_s10 + $0x30] sm:$0xff] %vm373_vm1, %v368_v18  ;;  %v319_v19 = vpop.f32.mrf.mxu0  ;;  %v364_v20 = vpop.f32.mrf.mxu1 }
  0xd3   : > { %v320_v21 = vadd.f32 %v604_v10, %v319_v19  ;;  %v365_v22 = vadd.f32 %v604_v10, %v364_v20 }
  0xd5   : > { %375 = vst.msk [vmem:[%s275_s10 + $0x8] sm:$0xff] %vm373_vm1, %v320_v21 }
  0xd6   : > { %v325_v23 = vpop.f32.mrf.mxu2  ;;  %379 = vst.msk [vmem:[%s275_s10 + $0x28] sm:$0xff] %vm373_vm1, %v365_v22  ;;  %v370_v24 = vpop.f32.mrf.mxu3 }
  0xd7   : > { %v326_v25 = vadd.f32 %v604_v10, %v325_v23  ;;  %v371_v26 = vadd.f32 %v604_v10, %v370_v24 }
  0xd9   : > { %377 = vst.msk [vmem:[%s275_s10 + $0x18] sm:$0xff] %vm373_vm1, %v326_v25 }
  0xda   : > { %381 = vst.msk [vmem:[%s275_s10 + $0x38] sm:$0xff] %vm373_vm1, %v371_v26 }
  0xdb   : > { %722 = shalt.err (!%p719_p11)
}
  0xdc   : > { %s774_s23 = smov 128   ;;  %s775_s27 = smov 8  }
  0xdd   : > { %546 = dma.vmem_to_hbm [thread:$0]  (%p871_p7), %s396_s24, 1024, %s398_s6, %s383_s19, %s774_s23, %s774_s23, %s775_s27  }
  0xde PF: > { %s412_s21 = sand.u32 1, %s757_s15   ;;  %p1022_p12 = scmp.ge.s32.totalorder %s769_s18, 2 }
  0xdf   : > { %s413_s13 = scalar_lea.sflag [#allocation4], %s412_s21 }
  0xe0   : > { %p560_p13 = pnand %p1022_p12, %p836_p6 }
  0xe2   : > { %p561_p0 = pneg %p560_p13 }
  0xe4   : > { %752 = dma.done.wait (%p561_p0), %s413_s13, 1024  }
  0xe5   : > { %754 = vsyncadd (%p561_p0), %s413_s13, 4294966272  ;;  %p20_p3 = scmp.ge.s32.totalorder %s854_s29, 4   ;;  %s1023_s15 = smov %s761_s16 }
  0xe6   : > { %s1024_s16 = smov %s765_s17  ;;  %s1025_s17 = smov %s867_s8 }
  0xe7   : > { %s1026_s18 = smov %s854_s29  ;;  %22 = sbr.rel (!%p20_p3) target bundleno = 10 (0xa), region = 98 }
  0xec   :  { %419 = vsyncpa [#allocation3], 1 }
  0xed   :  { %421 = vsyncpa [#allocation3 + $0x1], 1 }
  0xee   :  { %422 = vsyncpa [#allocation6], 1 }
  0xef   :  { %424 = vsyncpa [#allocation6 + $0x1], 1 }
  0xf0   :  { %425 = vsyncpa [#allocation4], 1 }
  0xf1   :  { %427 = vsyncpa [#allocation4 + $0x1], 1 }

</bundles_post_ra>
